<compile_context>
chip_gen: v5e
topology: v5e:2x2
jax: 0.10.0
libtpu: 0.0.40
codegen_flags: <defaults>
</compile_context>

<pallas_src>
import functools

import jax
import jax.numpy as jnp
import numpy as np
from jax.experimental import pallas as pl
from jax.experimental.pallas import tpu as pltpu

_LANES = 128
_ROW_ALIGN = 32           # block-row alignment: multiple of native sublane tiling (f32/bf16/int8)
_MAX_TILE_ROWS = 4096     # (4096, 128) f32 block = 2 MiB -> on the ~85%-of-HBM-roofline plateau
_FALLBACK_ELEMS = 8192    # below this a fused XLA reduction beats pallas_call launch overhead


def _cdiv(a, b):
    return -(-a // b)


def _default_num_splits():
    """2-way row split only on chips with two TensorCores per device."""
    try:
        kind = jax.devices()[0].device_kind.lower()
    except Exception:  # defensive: never let detection break the math
        return 1
    return 2 if any(tag in kind for tag in ("v4", "v5p", "v7")) else 1


def _sq_err_sum_kernel(x_ref, y_ref, out_ref, acc_ref, *, steps, valid_blocks, exact):
    """Accumulate sum((x - y)^2) for one parallel split of the row-block axis."""
    i = pl.program_id(1)

    @pl.when(i == 0)
    def _():
        acc_ref[...] = jnp.zeros_like(acc_ref)

    # Cast in-kernel so bf16/fp16 inputs keep their halved HBM traffic.
    diff = x_ref[...].astype(jnp.float32) - y_ref[...].astype(jnp.float32)
    sq = diff * diff
    # Partial-reduce the (tile_rows, 128) tile down to one (8, 128) vreg with
    # pure VALU adds (the reshape only regroups native (8, 128) tiles, no data
    # movement); the single expensive cross-lane reduce happens once per split
    # in the finalize step below. Keeping the accumulator at one vreg also cuts
    # a vld+vst per result vreg in the inner loop and frees VMEM for big blocks.
    contrib = jnp.sum(sq.reshape(-1, 8, _LANES), axis=0)

    if exact:
        acc_ref[...] += contrib
    else:
        # Grid was rounded up for the 2-way split: skip the overhang block.
        g = pl.program_id(0) * steps + i

        @pl.when(g < valid_blocks)
        def _():
            acc_ref[...] += contrib

    @pl.when(i == steps - 1)
    def _():
        out_ref[...] = jnp.sum(acc_ref[...], keepdims=True)


def _sq_err_sum_pallas(x2, y2, *, num_splits, steps, tile_rows, valid_blocks):
    exact = (num_splits * steps == valid_blocks)
    last_block = valid_blocks - 1
    if exact:
        in_map = lambda p, i: (p * steps + i, 0)
    else:
        # Clamp the (single) overhang block's index so its DMA stays fully in
        # bounds; its contribution is skipped inside the kernel.
        in_map = lambda p, i: (jnp.minimum(p * steps + i, last_block), 0)

    kernel = functools.partial(
        _sq_err_sum_kernel, steps=steps, valid_blocks=valid_blocks, exact=exact)

    partial_sums = pl.pallas_call(
        kernel,
        out_shape=jax.ShapeDtypeStruct((num_splits, 1, 1), jnp.float32),
        grid_spec=pltpu.PrefetchScalarGridSpec(
            num_scalar_prefetch=0,
            grid=(num_splits, steps),
            in_specs=[
                pl.BlockSpec((tile_rows, _LANES), in_map),
                pl.BlockSpec((tile_rows, _LANES), in_map),
            ],
            out_specs=pl.BlockSpec((None, 1, 1), lambda p, i: (p, 0, 0)),
            scratch_shapes=[pltpu.VMEM((8, _LANES), jnp.float32)],
        ),
        compiler_params=pltpu.CompilerParams(
            dimension_semantics=("parallel", "arbitrary"),
            # Footprint: 2 inputs x 2 buffers x block (<= 8 MiB f32) + 4 KiB acc.
            # 32 MiB is safely above v5e's 16 MiB default scoped limit and at/below
            # the default on v6e/v7x (v7x physical is 64 MiB).
            vmem_limit_bytes=32 * 1024 * 1024,
        ),
    )(x2, y2)
    return jnp.sum(partial_sums)


def psnr_pallas(x, y, eps=1e-6, *, max_tile_rows=_MAX_TILE_ROWS, num_splits=None):
    """Matches PSNR.forward: 10 * log10(1 / mse(X, Y)).

    `eps` is accepted but unused, exactly like the PyTorch reference module.
    """
    assert x.shape == y.shape, "X and Y must have the same shape"
    n_total = int(np.prod(x.shape))
    assert n_total > 0

    xf = jnp.ravel(x)  # free reshape of contiguous data; dtype cast happens in-kernel
    yf = jnp.ravel(y)

    if n_total <= _FALLBACK_ELEMS:
        # Tiny tensors: fixed pallas_call launch + per-step overhead dominates;
        # a fused XLA reduction is faster and avoids all tiling machinery.
        sq_sum = jnp.sum(jnp.square(xf.astype(jnp.float32) - yf.astype(jnp.float32)))
        mse = sq_sum / n_total
        return 10.0 * jnp.log10(1.0 / mse)

    if n_total % _LANES:
        # TODO(synk): rare path -- when the element count is not a multiple of
        # 128 the flat array cannot be re-viewed as (rows, 128) for free, so we
        # pay one pad copy. Typical image tensors take the zero-copy branch.
        pad = _LANES - n_total % _LANES
        xf = jnp.pad(xf, (0, pad))
        yf = jnp.pad(yf, (0, pad))

    rows = xf.shape[0] // _LANES
    x2 = xf.reshape(rows, _LANES)   # zero-copy view of contiguous data
    y2 = yf.reshape(rows, _LANES)

    tile_rows = max(
        _ROW_ALIGN,
        min((max_tile_rows // _ROW_ALIGN) * _ROW_ALIGN,
            (rows // _ROW_ALIGN) * _ROW_ALIGN),
    )
    valid_blocks = rows // tile_rows              # full blocks handled by Pallas
    tail_rows = rows - valid_blocks * tile_rows   # ragged tail (< one block)

    if num_splits is None:
        num_splits = _default_num_splits()
    num_splits = max(1, min(int(num_splits), valid_blocks))
    steps = _cdiv(valid_blocks, num_splits)

    sq_sum = _sq_err_sum_pallas(
        x2, y2, num_splits=num_splits, steps=steps,
        tile_rows=tile_rows, valid_blocks=valid_blocks)

    if tail_rows:
        # The slice fuses into this small reduction -> no extra HBM copy.
        xt = x2[valid_blocks * tile_rows:].astype(jnp.float32)
        yt = y2[valid_blocks * tile_rows:].astype(jnp.float32)
        sq_sum = sq_sum + jnp.sum(jnp.square(xt - yt))

    mse = sq_sum / n_total
    # Note: mse == 0 yields +inf, same as the reference formula.
    return 10.0 * jnp.log10(1.0 / mse)


def psnr_ref(x, y):
    mse = jnp.mean(jnp.square(x.astype(jnp.float32) - y.astype(jnp.float32)))
    return 10.0 * jnp.log10(1.0 / mse)


if __name__ == "__main__":
    cases = [
        # (shape, dtype, kwargs)
        ((2, 4, 16, 16), jnp.float32, {}),                    # spec shape -> tiny-input fallback
        ((2, 4, 48, 63), jnp.float32, {}),                    # one Pallas block + ragged row tail
        ((2, 3, 96, 180), jnp.float32, {"max_tile_rows": 256}),   # multi-step accumulation + tail
        ((2, 3, 96, 180), jnp.float32, {"max_tile_rows": 160, "num_splits": 2}),  # 2-way split with overhang block
        ((3, 3, 37, 41), jnp.float32, {}),                    # element count not a multiple of 128
        ((2, 4, 48, 63), jnp.bfloat16, {}),                   # in-kernel cast path
    ]

    key = jax.random.PRNGKey(0)
    for shape, dtype, kwargs in cases:
        key, kx, ky = jax.random.split(key, 3)
        X = jax.random.uniform(kx, shape, dtype=jnp.float32).astype(dtype)
        Y = jax.random.uniform(ky, shape, dtype=jnp.float32).astype(dtype)

        out = jax.block_until_ready(psnr_pallas(X, Y, **kwargs))
        ref = jax.block_until_ready(psnr_ref(X, Y))
        np.testing.assert_allclose(np.asarray(out), np.asarray(ref),
                                   rtol=1e-4, atol=1e-4)

    print("KERNEL_OK")
</pallas_src>

<mosaic_0001>
module attributes {stable_mosaic.version = 11 : i64} {
  func.func @_sq_err_sum_kernel(%arg0: i32, %arg1: i32, %arg2: memref<160x128xf32, #tpu.memory_space<vmem>>, %arg3: memref<160x128xf32, #tpu.memory_space<vmem>>, %arg4: memref<1x1x1xf32, #tpu.memory_space<vmem>>, %arg5: memref<8x128xf32, #tpu.memory_space<vmem>>) attributes {dimension_semantics = [#tpu.dimension_semantics<parallel>, #tpu.dimension_semantics<arbitrary>], iteration_bounds = array<i64: 1, 1>, scalar_prefetch = 0 : i64, scratch_operands = 1 : i64, tpu.core_type = #tpu.core_type<tc>, window_params = [{transform_indices = @transform_0, window_bounds = array<i64: 160, 128>}, {transform_indices = @transform_1, window_bounds = array<i64: 160, 128>}, {transform_indices = @transform_2, window_bounds = array<i64: 1, 1, 1>}]} {
    %c0_i32 = arith.constant 0 : i32
    %0 = arith.cmpi eq, %arg1, %c0_i32 : i32
    %1 = arith.extui %0 : i1 to i32
    %c0_i32_0 = arith.constant 0 : i32
    %2 = arith.cmpi ne, %1, %c0_i32_0 : i32
    scf.if %2 {
      %cst_10 = arith.constant 0.000000e+00 : f32
      %15 = vector.broadcast %cst_10 : f32 to vector<8x128xf32>
      %c0_11 = arith.constant 0 : index
      %c0_12 = arith.constant 0 : index
      %16 = vector.load %arg5[%c0_11, %c0_12] : memref<8x128xf32, #tpu.memory_space<vmem>>, vector<8x128xf32>
      tpu.vector_store %arg5[%c0_11, %c0_12], %15 {strides = array<i32>} : memref<8x128xf32, #tpu.memory_space<vmem>>, vector<8x128xf32>,
    } else {
    }
    %c0 = arith.constant 0 : index
    %c0_1 = arith.constant 0 : index
    %3 = vector.load %arg2[%c0, %c0_1] : memref<160x128xf32, #tpu.memory_space<vmem>>, vector<160x128xf32>
    %c0_2 = arith.constant 0 : index
    %c0_3 = arith.constant 0 : index
    %4 = vector.load %arg3[%c0_2, %c0_3] : memref<160x128xf32, #tpu.memory_space<vmem>>, vector<160x128xf32>
    %5 = arith.subf %3, %4 : vector<160x128xf32>
    %6 = arith.mulf %5, %5 : vector<160x128xf32>
    %7 = vector.shape_cast %6 : vector<160x128xf32> to vector<20x8x128xf32>
    %cst = arith.constant dense<0.000000e+00> : vector<8x128xf32>
    %8 = vector.multi_reduction <add>, %7, %cst [0] : vector<20x8x128xf32> to vector<8x128xf32>
    %c0_4 = arith.constant 0 : index
    %c0_5 = arith.constant 0 : index
    %9 = vector.load %arg5[%c0_4, %c0_5] : memref<8x128xf32, #tpu.memory_space<vmem>>, vector<8x128xf32>
    %10 = arith.addf %9, %8 : vector<8x128xf32>
    %c0_6 = arith.constant 0 : index
    %c0_7 = arith.constant 0 : index
    %11 = vector.load %arg5[%c0_6, %c0_7] : memref<8x128xf32, #tpu.memory_space<vmem>>, vector<8x128xf32>
    tpu.vector_store %arg5[%c0_6, %c0_7], %10 {strides = array<i32>} : memref<8x128xf32, #tpu.memory_space<vmem>>, vector<8x128xf32>,
    %c0_i32_8 = arith.constant 0 : i32
    %12 = arith.cmpi eq, %arg1, %c0_i32_8 : i32
    %13 = arith.extui %12 : i1 to i32
    %c0_i32_9 = arith.constant 0 : i32
    %14 = arith.cmpi ne, %13, %c0_i32_9 : i32
    scf.if %14 {
      %c0_10 = arith.constant 0 : index
      %c0_11 = arith.constant 0 : index
      %15 = vector.load %arg5[%c0_10, %c0_11] : memref<8x128xf32, #tpu.memory_space<vmem>>, vector<8x128xf32>
      %16 = vector.shape_cast %15 : vector<8x128xf32> to vector<1x8x128xf32>
      %cst_12 = arith.constant dense<0.000000e+00> : vector<1xf32>
      %17 = vector.multi_reduction <add>, %16, %cst_12 [1, 2] : vector<1x8x128xf32> to vector<1xf32>
      %18 = vector.shape_cast %17 : vector<1xf32> to vector<1x1x1xf32>
      %19 = vector.extract %18[0, 0, 0] : f32 from vector<1x1x1xf32>
      %20 = vector.broadcast %19 : f32 to vector<1x1xf32>
      %c0_13 = arith.constant 0 : index
      %c0_14 = arith.constant 0 : index
      %c0_15 = arith.constant 0 : index
      %21 = vector.load %arg4[%c0_13, %c0_14, %c0_15] : memref<1x1x1xf32, #tpu.memory_space<vmem>>, vector<1x1x1xf32>
      %22 = vector.shape_cast %21 : vector<1x1x1xf32> to vector<1x1xf32>
      %23 = vector.shape_cast %20 : vector<1x1xf32> to vector<1x1x1xf32>
      tpu.vector_store %arg4[%c0_13, %c0_14, %c0_15], %23 {strides = array<i32>} : memref<1x1x1xf32, #tpu.memory_space<vmem>>, vector<1x1x1xf32>,
    } else {
    }
    return
  }
  func.func @transform_0(%arg0: i32, %arg1: i32) -> (i32, i32) {
    %c1_i32 = arith.constant 1 : i32
    %0 = arith.muli %arg0, %c1_i32 : i32
    %1 = arith.addi %0, %arg1 : i32
    %c0_i32 = arith.constant 0 : i32
    %c0_i32_0 = arith.constant 0 : i32
    return %1, %c0_i32 : i32, i32
  }
  func.func @transform_1(%arg0: i32, %arg1: i32) -> (i32, i32) {
    %c1_i32 = arith.constant 1 : i32
    %0 = arith.muli %arg0, %c1_i32 : i32
    %1 = arith.addi %0, %arg1 : i32
    %c0_i32 = arith.constant 0 : i32
    %c0_i32_0 = arith.constant 0 : i32
    return %1, %c0_i32 : i32, i32
  }
  func.func @transform_2(%arg0: i32, %arg1: i32) -> (i32, i32, i32) {
    %c0_i32 = arith.constant 0 : i32
    %c0_i32_0 = arith.constant 0 : i32
    %c0_i32_1 = arith.constant 0 : i32
    return %arg0, %c0_i32, %c0_i32_0 : i32, i32, i32
  }
}

</mosaic_0001>

<bundles_post_ra>
// kernel: tpu_custom_call.1
= control target key start
LH: loop header
LB: loop body
LE: loop exit
PB: predicated region body
PF: predicated region fallthrough
CT: control target
= control target key end

     0   :  { %7 = vsyncpa [#allocation4], 0  ;;  %s333_s0 = inlined_call_operand.hbm [shape: f32[189,128], index: 0, kind: input, shape index: {}]   ;;  %s334_s1 = inlined_call_operand.hbm [shape: f32[189,128], index: 1, kind: input, shape index: {}]   ;;  %s335_s2 = inlined_call_operand.hbm [shape: f32[1,1,1], index: 2, kind: output, shape index: {}]  }
   0x1   :  { %8 = vsyncpa [#allocation7], 0 }
   0x2   :  { %9 = vsyncpa [#allocation5], 0  ;;  %s25_s11 = sshll.u32 %s333_s0, 4  ;;  %s304_s12 = smov [#allocation3]   ;;  %s26_s11 = int_to_ptr.hbm [resolvable:$true] %s25_s11 }
   0x3   :  { %s27_s13 = sshll.u32 %s304_s12, 4  ;;  %s49_s16 = sshll.u32 %s334_s1, 4  ;;  %s28_s13 = int_to_ptr.vmem [resolvable:$true] %s27_s13  ;;  %s50_s16 = int_to_ptr.hbm [resolvable:$true] %s49_s16 }
   0x4   :  { %s305_s17 = smov 128   ;;  %s306_s18 = smov 8  }
   0x5   :  { %33 = dma.hbm_to_vmem [thread:$0]  %s26_s11, 2560, %s28_s13, [#allocation4], %s305_s17, %s305_s17, %s306_s18  }
   0x6   :  { %s307_s19 = smov [#allocation6]  }
   0x7   :  { %s51_s20 = sshll.u32 %s307_s19, 4  ;;  %s52_s20 = int_to_ptr.vmem [resolvable:$true] %s51_s20 }
   0x8   :  { %57 = dma.hbm_to_vmem [thread:$0]  %s50_s16, 2560, %s52_s20, [#allocation7], %s305_s17, %s305_s17, %s306_s18  }
   0x9   :  { %298 = dma.done.wait [#allocation4], 2560  }
   0xa   :  { %299 = vsyncadd [#allocation4], 4294964736 }
   0xb   :  { %300 = dma.done.wait [#allocation7], 2560  }
   0xc   :  { %301 = vsyncadd [#allocation7], 4294964736  ;;  %v83_v0 = vld [vmem:[#allocation3] sm:$0xff]  ;;  %v84_v1 = vld [vmem:[#allocation3 + $0x8] sm:$0xff]  ;;  %s308_s0 = smov [#allocation8]   ;;  %s208_s23 = sshll.u32 %s335_s2, 4  ;;  %s209_s23 = int_to_ptr.hbm [resolvable:$true] %s208_s23 }
   0xd   :  { %v103_v2 = vld [vmem:[#allocation6] sm:$0xff]  ;;  %v104_v3 = vld [vmem:[#allocation6 + $0x8] sm:$0xff]  ;;  %v85_v4 = vld [vmem:[#allocation3 + $0x10] sm:$0xff]  ;;  %s206_s1 = sshll.u32 %s308_s0, 4  ;;  %vm199_vm0 = vcmask 0   ;;  %s207_s1 = int_to_ptr.vmem [resolvable:$true] %s206_s1 }
   0xe   :  { %v105_v5 = vld [vmem:[#allocation6 + $0x10] sm:$0xff]  ;;  %v123_v6 = vsub.f32 %v83_v0, %v103_v2  ;;  %v124_v7 = vsub.f32 %v84_v1, %v104_v3  ;;  %v86_v8 = vld [vmem:[#allocation3 + $0x18] sm:$0xff]  ;;  %v87_v11 = vld [vmem:[#allocation3 + $0x20] sm:$0xff] }
   0xf   :  { %v106_v9 = vld [vmem:[#allocation6 + $0x18] sm:$0xff]  ;;  %v125_v10 = vsub.f32 %v85_v4, %v105_v5  ;;  %v107_v12 = vld [vmem:[#allocation6 + $0x20] sm:$0xff]  ;;  %v88_v16 = vld [vmem:[#allocation3 + $0x28] sm:$0xff] }
  0x10   :  { %v126_v13 = vsub.f32 %v86_v8, %v106_v9  ;;  %v143_v14 = vmul.f32 %v123_v6, %v123_v6  ;;  %v144_v15 = vmul.f32 %v124_v7, %v124_v7  ;;  %v108_v17 = vld [vmem:[#allocation6 + $0x28] sm:$0xff]  ;;  %v127_v18 = vsub.f32 %v87_v11, %v107_v12  ;;  %v89_v20 = vld [vmem:[#allocation3 + $0x30] sm:$0xff]  ;;  %v90_v25 = vld [vmem:[#allocation3 + $0x38] sm:$0xff] }
  0x11   :  { %v145_v19 = vmul.f32 %v125_v10, %v125_v10  ;;  %v109_v21 = vld [vmem:[#allocation6 + $0x30] sm:$0xff]  ;;  %v128_v22 = vsub.f32 %v88_v16, %v108_v17  ;;  %v110_v26 = vld [vmem:[#allocation6 + $0x38] sm:$0xff]  ;;  %v91_v30 = vld [vmem:[#allocation3 + $0x40] sm:$0xff] }
  0x12   :  { %v146_v23 = vmul.f32 %v126_v13, %v126_v13  ;;  %v163_v24 = vadd.f32 %v144_v15, %v143_v14  ;;  %v129_v27 = vsub.f32 %v89_v20, %v109_v21  ;;  %v147_v28 = vmul.f32 %v127_v18, %v127_v18  ;;  %v111_v31 = vld [vmem:[#allocation6 + $0x40] sm:$0xff]  ;;  %v92_v35 = vld [vmem:[#allocation3 + $0x48] sm:$0xff]  ;;  %v93_v40 = vld [vmem:[#allocation3 + $0x50] sm:$0xff] }
  0x13   :  { %v130_v32 = vsub.f32 %v90_v25, %v110_v26  ;;  %v148_v33 = vmul.f32 %v128_v22, %v128_v22  ;;  %v112_v36 = vld [vmem:[#allocation6 + $0x48] sm:$0xff]  ;;  %v131_v37 = vsub.f32 %v91_v30, %v111_v31  ;;  %v113_v41 = vld [vmem:[#allocation6 + $0x50] sm:$0xff]  ;;  %v94_v45 = vld [vmem:[#allocation3 + $0x58] sm:$0xff] }
  0x14   :  { %v164_v29 = vadd.f32 %v163_v24, %v145_v19  ;;  %v149_v38 = vmul.f32 %v129_v27, %v129_v27  ;;  %v132_v42 = vsub.f32 %v92_v35, %v112_v36  ;;  %v114_v46 = vld [vmem:[#allocation6 + $0x58] sm:$0xff]  ;;  %v133_v47 = vsub.f32 %v93_v40, %v113_v41  ;;  %v95_v50 = vld [vmem:[#allocation3 + $0x60] sm:$0xff]  ;;  %v96_v55 = vld [vmem:[#allocation3 + $0x68] sm:$0xff] }
  0x15   :  { %v150_v43 = vmul.f32 %v130_v32, %v130_v32  ;;  %v151_v48 = vmul.f32 %v131_v37, %v131_v37  ;;  %v115_v51 = vld [vmem:[#allocation6 + $0x60] sm:$0xff]  ;;  %v134_v52 = vsub.f32 %v94_v45, %v114_v46  ;;  %v116_v56 = vld [vmem:[#allocation6 + $0x68] sm:$0xff]  ;;  %v97_v60 = vld [vmem:[#allocation3 + $0x70] sm:$0xff] }
  0x16   :  { %v165_v34 = vadd.f32 %v164_v29, %v146_v23  ;;  %v152_v53 = vmul.f32 %v132_v42, %v132_v42  ;;  %v135_v57 = vsub.f32 %v95_v50, %v115_v51  ;;  %v153_v58 = vmul.f32 %v133_v47, %v133_v47  ;;  %v117_v61 = vld [vmem:[#allocation6 + $0x70] sm:$0xff]  ;;  %v98_v1 = vld [vmem:[#allocation3 + $0x78] sm:$0xff]  ;;  %v99_v6 = vld [vmem:[#allocation3 + $0x80] sm:$0xff] }
  0x17   :  { %v136_v62 = vsub.f32 %v96_v55, %v116_v56  ;;  %v154_v63 = vmul.f32 %v134_v52, %v134_v52  ;;  %v118_v2 = vld [vmem:[#allocation6 + $0x78] sm:$0xff]  ;;  %v137_v3 = vsub.f32 %v97_v60, %v117_v61  ;;  %v119_v7 = vld [vmem:[#allocation6 + $0x80] sm:$0xff]  ;;  %v100_v11 = vld [vmem:[#allocation3 + $0x88] sm:$0xff] }
  0x18   :  { %v166_v39 = vadd.f32 %v165_v34, %v147_v28  ;;  %v155_v4 = vmul.f32 %v135_v57, %v135_v57  ;;  %v138_v8 = vsub.f32 %v98_v1, %v118_v2  ;;  %v120_v12 = vld [vmem:[#allocation6 + $0x88] sm:$0xff]  ;;  %v139_v13 = vsub.f32 %v99_v6, %v119_v7  ;;  %v101_v16 = vld [vmem:[#allocation3 + $0x90] sm:$0xff]  ;;  %v102_v21 = vld [vmem:[#allocation3 + $0x98] sm:$0xff] }
  0x19   :  { %v156_v9 = vmul.f32 %v136_v62, %v136_v62  ;;  %v157_v14 = vmul.f32 %v137_v3, %v137_v3  ;;  %v121_v17 = vld [vmem:[#allocation6 + $0x90] sm:$0xff]  ;;  %v140_v18 = vsub.f32 %v100_v11, %v120_v12  ;;  %v122_v22 = vld [vmem:[#allocation6 + $0x98] sm:$0xff] }
  0x1a   :  { %v167_v44 = vadd.f32 %v166_v39, %v148_v33  ;;  %v158_v19 = vmul.f32 %v138_v8, %v138_v8  ;;  %v141_v23 = vsub.f32 %v101_v16, %v121_v17  ;;  %v159_v24 = vmul.f32 %v139_v13, %v139_v13 }
  0x1b   :  { %v142_v26 = vsub.f32 %v102_v21, %v122_v22  ;;  %v160_v27 = vmul.f32 %v140_v18, %v140_v18 }
  0x1c   :  { %v168_v49 = vadd.f32 %v167_v44, %v149_v38  ;;  %v161_v29 = vmul.f32 %v141_v23, %v141_v23 }
  0x1d   :  { %v162_v31 = vmul.f32 %v142_v26, %v142_v26 }
  0x1e   :  { %v169_v54 = vadd.f32 %v168_v49, %v150_v43 }
  0x20   :  { %v170_v59 = vadd.f32 %v169_v54, %v151_v48 }
  0x22   :  { %v171_v0 = vadd.f32 %v170_v59, %v152_v53 }
  0x24   :  { %v172_v5 = vadd.f32 %v171_v0, %v153_v58 }
  0x26   :  { %v173_v10 = vadd.f32 %v172_v5, %v154_v63 }
  0x28   :  { %v174_v15 = vadd.f32 %v173_v10, %v155_v4 }
  0x2a   :  { %v175_v20 = vadd.f32 %v174_v15, %v156_v9 }
  0x2c   :  { %v176_v25 = vadd.f32 %v175_v20, %v157_v14 }
  0x2e   :  { %v177_v28 = vadd.f32 %v176_v25, %v158_v19 }
  0x30   :  { %v178_v30 = vadd.f32 %v177_v28, %v159_v24 }
  0x32   :  { %v179_v32 = vadd.f32 %v178_v30, %v160_v27 }
  0x34   :  { %v180_v33 = vadd.f32 %v179_v32, %v161_v29 }
  0x36   :  { %v181_v34 = vadd.f32 %v180_v33, %v162_v31 }
  0x38   :  { %189 = vadd.xlane.f32.xlu0 %v181_v34 }
  0xab   :  { %v190_v35 = vpop.xlane.xlu0 %189 }
  0xac   :  { %v191_v36 = vrot.slane %v190_v35, 4 }
  0xae   :  { %v192_v37 = vadd.f32 %v191_v36, %v190_v35 }
  0xb0   :  { %v193_v38 = vrot.slane %v192_v37, 2 }
  0xb2   :  { %v194_v39 = vadd.f32 %v193_v38, %v192_v37 }
  0xb4   :  { %v195_v40 = vrot.slane %v194_v39, 1 }
  0xb6   :  { %v196_v41 = vadd.f32 %v195_v40, %v194_v39 }
  0xb8   :  { %219 = vpush %v196_v41 }
  0xe9   :  { %s220_s24 = spop %219 }
  0xea   :  { %v198_v42 = vstv %s220_s24 }
  0xeb   :  { %200 = vst.msk [vmem:[#allocation8] sm:$0x1] %vm199_vm0, %v198_v42 }
  0xec   :  { %211 = dma.vmem_to_hbm [thread:$0]  %s207_s1, 16, %s209_s23, [#allocation5]  }
  0xed   :  { %302 = dma.done.wait [#allocation5], 16  }
  0xee   :  { %303 = vsyncadd [#allocation5], 4294967280 }
  0xef   :  { %216 = vsyncpa [#allocation4], 1 }
  0xf0   :  { %217 = vsyncpa [#allocation7], 1 }
  0xf1   :  { %218 = vsyncpa [#allocation5], 1 }

</bundles_post_ra>
